<compile_context>
chip_gen: v5e
topology: v5e:2x2
jax: 0.10.0
libtpu: 0.0.40
codegen_flags: <defaults>
</compile_context>

<pallas_src>
import jax
import jax.numpy as jnp
from jax.experimental import pallas as pl
from jax.experimental.pallas import tpu as pltpu

_LANE = 128
_SUBLANE = 8


def _round_up(n, m):
    return ((n + m - 1) // m) * m


def _mlp_kernel(x_ref, w1_ref, b1_ref, w2_ref, b2_ref, w3_ref, b3_ref, out_ref):
    # x arrives as f32 straight from HBM; cast to bf16 on the VPU right before the
    # MXU (hidden under DMA/MXU work).  Accumulation / bias / ReLU stay in f32
    # (v5e VPU has no bf16 path).
    x = x_ref[...].astype(jnp.bfloat16)
    h = jnp.dot(x, w1_ref[...], preferred_element_type=jnp.float32)
    h = jnp.maximum(h + b1_ref[...], 0.0)
    h = jnp.dot(h.astype(jnp.bfloat16), w2_ref[...], preferred_element_type=jnp.float32)
    h = jnp.maximum(h + b2_ref[...], 0.0)
    h = jnp.dot(h.astype(jnp.bfloat16), w3_ref[...], preferred_element_type=jnp.float32)
    out_ref[...] = (h + b3_ref[...]).astype(out_ref.dtype)


def _block_spec(shape, index_map, buffers=None):
    """BlockSpec with optional multi-buffering; falls back if this JAX version
    does not support pipeline_mode / pl.Buffered."""
    if buffers is not None:
        try:
            return pl.BlockSpec(shape, index_map, pipeline_mode=pl.Buffered(buffers))
        except Exception:
            pass
    return pl.BlockSpec(shape, index_map)


def perceptron_forward(x_nchw, params):
    """x_nchw: (B, ...) float32, flattened like nn.Flatten.
    params: dict w1,b1,w2,b2,w3,b3; weights pre-transposed (in, out) in bf16,
    biases (1, out) in f32."""
    b = x_nchw.shape[0]
    x2d = x_nchw.reshape(b, -1)  # nn.Flatten: (B, C*H*W)

    w1, b1, w2, b2, w3, b3 = (params[k] for k in ("w1", "b1", "w2", "b2", "w3", "b3"))
    in_size, hidden = w1.shape
    out_size = w3.shape[1]
    assert x2d.shape[1] == in_size
    assert w2.shape == (hidden, hidden) and w3.shape[0] == hidden

    # Lane padding of the (small) weight/bias tensors so every matmul operand and
    # every store is lane-dense.  x itself is padded only when strictly needed.
    in_p = _round_up(in_size, _LANE)
    hid_p = _round_up(hidden, _LANE)
    out_p = _round_up(out_size, _LANE)

    def pad2(a, rows, cols):
        if a.shape == (rows, cols):
            return a
        return jnp.pad(a, ((0, rows - a.shape[0]), (0, cols - a.shape[1])))

    w1p = pad2(w1, in_p, hid_p)
    w2p = pad2(w2, hid_p, hid_p)
    w3p = pad2(w3, hid_p, out_p)
    b1p = pad2(b1, 1, hid_p)
    b2p = pad2(b2, 1, hid_p)
    b3p = pad2(b3, 1, out_p)

    weight_bytes = (w1p.size + w2p.size + w3p.size) * 2 + (b1p.size + b2p.size + b3p.size) * 4

    # --- generation-aware VMEM budget (v7x: 64 MiB/TC, v5e/v6e: 128 MiB) ---
    try:
        vmem_cap = int(pltpu.get_tpu_info().vmem_capacity_bytes)
    except Exception:
        vmem_cap = 64 * 1024 * 1024  # conservative fallback
    vmem_budget = min(int(vmem_cap * 0.7), 96 * 1024 * 1024)

    # Conservative footprint: Pallas double-buffers every input spec (including the
    # "resident" weights), plus the in-kernel f32/bf16 intermediates.
    def _vmem_bytes(tm_, x_bufs):
        x_tiles = x_bufs * tm_ * in_p * 4            # f32 input tiles (multi-buffered)
        out_tiles = 2 * tm_ * out_p * 4              # f32 output tiles (double-buffered)
        temps = tm_ * (in_p * 2 + 2 * hid_p * 4 + hid_p * 2 + out_p * 4)
        return x_tiles + out_tiles + 2 * weight_bytes + temps

    if _vmem_bytes(_SUBLANE, 2) > vmem_budget:
        # TODO(synk): add a hidden-dim (K/N) tiled fallback with a pl.when-initialized
        # accumulator for models whose weights alone exceed the VMEM budget.
        raise ValueError("Perceptron weights too large for resident-weight Pallas kernel")

    # --- batch tile: as large as VMEM allows (fewer grid steps on a mem-bound kernel) ---
    if b >= 512:
        tm = 512
    elif b >= 256:
        tm = 256
    elif b >= 128:
        tm = 128
    else:
        tm = b  # single full-batch tile; full-extent block is layout-legal

    while tm > _SUBLANE and _vmem_bytes(tm, 2) > vmem_budget:
        tm = max(_SUBLANE, _round_up(tm // 2, _SUBLANE))

    b_p = _round_up(b, tm)
    grid_steps = b_p // tm

    # Deeper input pipeline only when there are enough grid steps to benefit.
    x_buffers = 3 if (grid_steps >= 3 and _vmem_bytes(tm, 3) <= vmem_budget) else None

    # Pad x (kept f32 — no dtype-conversion pass) only if batch/feature padding is needed.
    x_p = pad2(x2d, b_p, in_p)

    flops = 2 * b_p * (in_p * hid_p + hid_p * hid_p + hid_p * out_p)
    bytes_accessed = b_p * in_p * 4 + weight_bytes + b_p * out_p * 4
    cost = pl.CostEstimate(flops=flops, transcendentals=0, bytes_accessed=bytes_accessed)

    resident = lambda shape: pl.BlockSpec(shape, lambda i: (0, 0))  # same block every step -> stays in VMEM

    out = pl.pallas_call(
        _mlp_kernel,
        out_shape=jax.ShapeDtypeStruct((b_p, out_p), jnp.float32),
        grid_spec=pltpu.PrefetchScalarGridSpec(
            num_scalar_prefetch=0,
            grid=(grid_steps,),
            in_specs=[
                _block_spec((tm, in_p), lambda i: (i, 0), buffers=x_buffers),  # batch-tiled x
                resident((in_p, hid_p)),
                resident((1, hid_p)),
                resident((hid_p, hid_p)),
                resident((1, hid_p)),
                resident((hid_p, out_p)),
                resident((1, out_p)),
            ],
            out_specs=pl.BlockSpec((tm, out_p), lambda i: (i, 0)),
        ),
        compiler_params=pltpu.CompilerParams(
            # TODO(synk): use pltpu.CORE_PARALLEL on v7x (2 TCs) once the TC count can be
            # queried robustly; "parallel" is the portable choice across v5e/v6e/v7x.
            dimension_semantics=("parallel",),
            vmem_limit_bytes=vmem_budget,
        ),
        cost_estimate=cost,
    )(x_p, w1p, b1p, w2p, b2p, w3p, b3p)

    return out[:b, :out_size]


def init_params(key, input_size, hidden_size, output_size):
    """Deterministic init mimicking nn.Linear's uniform(-1/sqrt(fan_in), 1/sqrt(fan_in)).
    Weights stored transposed (in, out) in bf16; biases (1, out) in f32."""
    ks = jax.random.split(key, 6)

    def lin(kw, kb, fan_in, fan_out):
        bound = 1.0 / jnp.sqrt(fan_in)
        w = jax.random.uniform(kw, (fan_in, fan_out), jnp.float32, -bound, bound)
        bias = jax.random.uniform(kb, (1, fan_out), jnp.float32, -bound, bound)
        return w.astype(jnp.bfloat16), bias

    w1, b1 = lin(ks[0], ks[1], input_size, hidden_size)
    w2, b2 = lin(ks[2], ks[3], hidden_size, hidden_size)
    w3, b3 = lin(ks[4], ks[5], hidden_size, output_size)
    return dict(w1=w1, b1=b1, w2=w2, b2=b2, w3=w3, b3=b3)


if __name__ == "__main__":
    key = jax.random.PRNGKey(0)
    kx, kp = jax.random.split(key)

    # Small, module-consistent shapes: image (B=8, C=1, H=16, W=16) -> input_size=256
    B, C, H, W = 8, 1, 16, 16
    input_size = C * H * W
    hidden_size = 128
    output_size = 16

    x = jax.random.normal(kx, (B, C, H, W), jnp.float32)
    params = init_params(kp, input_size, hidden_size, output_size)

    logits = perceptron_forward(x, params)
    jax.block_until_ready(logits)

    # Pure-JAX reference with the same mixed precision (bf16 matmul operands, f32 accumulate)
    x2d = x.reshape(B, -1).astype(jnp.bfloat16)
    h = jnp.maximum(jnp.dot(x2d, params["w1"], preferred_element_type=jnp.float32) + params["b1"], 0.0)
    h = jnp.maximum(jnp.dot(h.astype(jnp.bfloat16), params["w2"],
                            preferred_element_type=jnp.float32) + params["b2"], 0.0)
    ref = jnp.dot(h.astype(jnp.bfloat16), params["w3"],
                  preferred_element_type=jnp.float32) + params["b3"]

    assert logits.shape == (B, output_size)
    assert jnp.allclose(logits, ref, atol=1e-2, rtol=1e-2)

    print("KERNEL_OK")
</pallas_src>

<mosaic_0001>
module attributes {stable_mosaic.version = 11 : i64} {
  func.func @_mlp_kernel(%arg0: i32, %arg1: memref<8x256xf32, #tpu.memory_space<vmem>>, %arg2: memref<256x128xbf16, #tpu.memory_space<vmem>>, %arg3: memref<1x128xf32, #tpu.memory_space<vmem>>, %arg4: memref<128x128xbf16, #tpu.memory_space<vmem>>, %arg5: memref<1x128xf32, #tpu.memory_space<vmem>>, %arg6: memref<128x128xbf16, #tpu.memory_space<vmem>>, %arg7: memref<1x128xf32, #tpu.memory_space<vmem>>, %arg8: memref<8x128xf32, #tpu.memory_space<vmem>>) attributes {dimension_semantics = [#tpu.dimension_semantics<parallel>], iteration_bounds = array<i64: 1>, scalar_prefetch = 0 : i64, scratch_operands = 0 : i64, tpu.core_type = #tpu.core_type<tc>, window_params = [{transform_indices = @transform_0, window_bounds = array<i64: 8, 256>}, {pipeline_mode = #tpu.pipeline_mode<synchronous>, transform_indices = @transform_1, window_bounds = array<i64: 256, 128>}, {pipeline_mode = #tpu.pipeline_mode<synchronous>, transform_indices = @transform_2, window_bounds = array<i64: 1, 128>}, {pipeline_mode = #tpu.pipeline_mode<synchronous>, transform_indices = @transform_3, window_bounds = array<i64: 128, 128>}, {pipeline_mode = #tpu.pipeline_mode<synchronous>, transform_indices = @transform_4, window_bounds = array<i64: 1, 128>}, {pipeline_mode = #tpu.pipeline_mode<synchronous>, transform_indices = @transform_5, window_bounds = array<i64: 128, 128>}, {pipeline_mode = #tpu.pipeline_mode<synchronous>, transform_indices = @transform_6, window_bounds = array<i64: 1, 128>}, {transform_indices = @transform_7, window_bounds = array<i64: 8, 128>}]} {
    %c0 = arith.constant 0 : index
    %c0_0 = arith.constant 0 : index
    %0 = vector.load %arg1[%c0, %c0_0] : memref<8x256xf32, #tpu.memory_space<vmem>>, vector<8x256xf32>
    %1 = arith.truncf %0 : vector<8x256xf32> to vector<8x256xbf16>
    %c0_1 = arith.constant 0 : index
    %c0_2 = arith.constant 0 : index
    %2 = vector.load %arg2[%c0_1, %c0_2] : memref<256x128xbf16, #tpu.memory_space<vmem>>, vector<256x128xbf16>
    %cst = arith.constant dense<0.000000e+00> : vector<8x128xf32>
    %3 = tpu.matmul %1, %2, %cst {dimension_numbers = #tpu.dot_dimension_numbers<[1], [0], [0], [1], [0, 0, 1, 1], [], []>} : vector<8x256xbf16>, vector<256x128xbf16>, vector<8x128xf32> -> vector<8x128xf32>
    %c0_3 = arith.constant 0 : index
    %c0_4 = arith.constant 0 : index
    %4 = vector.load %arg3[%c0_3, %c0_4] : memref<1x128xf32, #tpu.memory_space<vmem>>, vector<1x128xf32>
    %5 = vector.broadcast %4 : vector<1x128xf32> to vector<8x128xf32>
    %6 = arith.addf %3, %5 : vector<8x128xf32>
    %cst_5 = arith.constant 0.000000e+00 : f32
    %7 = vector.broadcast %cst_5 : f32 to vector<8x128xf32>
    %8 = arith.maximumf %6, %7 : vector<8x128xf32>
    %9 = arith.truncf %8 : vector<8x128xf32> to vector<8x128xbf16>
    %c0_6 = arith.constant 0 : index
    %c0_7 = arith.constant 0 : index
    %10 = vector.load %arg4[%c0_6, %c0_7] : memref<128x128xbf16, #tpu.memory_space<vmem>>, vector<128x128xbf16>
    %cst_8 = arith.constant dense<0.000000e+00> : vector<8x128xf32>
    %11 = tpu.matmul %9, %10, %cst_8 {dimension_numbers = #tpu.dot_dimension_numbers<[1], [0], [0], [1], [0, 0, 1, 1], [], []>} : vector<8x128xbf16>, vector<128x128xbf16>, vector<8x128xf32> -> vector<8x128xf32>
    %c0_9 = arith.constant 0 : index
    %c0_10 = arith.constant 0 : index
    %12 = vector.load %arg5[%c0_9, %c0_10] : memref<1x128xf32, #tpu.memory_space<vmem>>, vector<1x128xf32>
    %13 = vector.broadcast %12 : vector<1x128xf32> to vector<8x128xf32>
    %14 = arith.addf %11, %13 : vector<8x128xf32>
    %cst_11 = arith.constant 0.000000e+00 : f32
    %15 = vector.broadcast %cst_11 : f32 to vector<8x128xf32>
    %16 = arith.maximumf %14, %15 : vector<8x128xf32>
    %17 = arith.truncf %16 : vector<8x128xf32> to vector<8x128xbf16>
    %c0_12 = arith.constant 0 : index
    %c0_13 = arith.constant 0 : index
    %18 = vector.load %arg6[%c0_12, %c0_13] : memref<128x128xbf16, #tpu.memory_space<vmem>>, vector<128x128xbf16>
    %cst_14 = arith.constant dense<0.000000e+00> : vector<8x128xf32>
    %19 = tpu.matmul %17, %18, %cst_14 {dimension_numbers = #tpu.dot_dimension_numbers<[1], [0], [0], [1], [0, 0, 1, 1], [], []>} : vector<8x128xbf16>, vector<128x128xbf16>, vector<8x128xf32> -> vector<8x128xf32>
    %c0_15 = arith.constant 0 : index
    %c0_16 = arith.constant 0 : index
    %20 = vector.load %arg7[%c0_15, %c0_16] : memref<1x128xf32, #tpu.memory_space<vmem>>, vector<1x128xf32>
    %21 = vector.broadcast %20 : vector<1x128xf32> to vector<8x128xf32>
    %22 = arith.addf %19, %21 : vector<8x128xf32>
    %c0_17 = arith.constant 0 : index
    %c0_18 = arith.constant 0 : index
    %23 = vector.load %arg8[%c0_17, %c0_18] : memref<8x128xf32, #tpu.memory_space<vmem>>, vector<8x128xf32>
    tpu.vector_store %arg8[%c0_17, %c0_18], %22 {strides = array<i32>} : memref<8x128xf32, #tpu.memory_space<vmem>>, vector<8x128xf32>,
    return
  }
  func.func @transform_0(%arg0: i32) -> (i32, i32) {
    %c0_i32 = arith.constant 0 : i32
    %c0_i32_0 = arith.constant 0 : i32
    return %arg0, %c0_i32 : i32, i32
  }
  func.func @transform_1(%arg0: i32) -> (i32, i32) {
    %c0_i32 = arith.constant 0 : i32
    %c0_i32_0 = arith.constant 0 : i32
    %c0_i32_1 = arith.constant 0 : i32
    return %c0_i32, %c0_i32_0 : i32, i32
  }
  func.func @transform_2(%arg0: i32) -> (i32, i32) {
    %c0_i32 = arith.constant 0 : i32
    %c0_i32_0 = arith.constant 0 : i32
    %c0_i32_1 = arith.constant 0 : i32
    return %c0_i32, %c0_i32_0 : i32, i32
  }
  func.func @transform_3(%arg0: i32) -> (i32, i32) {
    %c0_i32 = arith.constant 0 : i32
    %c0_i32_0 = arith.constant 0 : i32
    %c0_i32_1 = arith.constant 0 : i32
    return %c0_i32, %c0_i32_0 : i32, i32
  }
  func.func @transform_4(%arg0: i32) -> (i32, i32) {
    %c0_i32 = arith.constant 0 : i32
    %c0_i32_0 = arith.constant 0 : i32
    %c0_i32_1 = arith.constant 0 : i32
    return %c0_i32, %c0_i32_0 : i32, i32
  }
  func.func @transform_5(%arg0: i32) -> (i32, i32) {
    %c0_i32 = arith.constant 0 : i32
    %c0_i32_0 = arith.constant 0 : i32
    %c0_i32_1 = arith.constant 0 : i32
    return %c0_i32, %c0_i32_0 : i32, i32
  }
  func.func @transform_6(%arg0: i32) -> (i32, i32) {
    %c0_i32 = arith.constant 0 : i32
    %c0_i32_0 = arith.constant 0 : i32
    %c0_i32_1 = arith.constant 0 : i32
    return %c0_i32, %c0_i32_0 : i32, i32
  }
  func.func @transform_7(%arg0: i32) -> (i32, i32) {
    %c0_i32 = arith.constant 0 : i32
    %c0_i32_0 = arith.constant 0 : i32
    return %arg0, %c0_i32 : i32, i32
  }
}

</mosaic_0001>

<bundles_post_ra>
// kernel: tpu_custom_call.1
= control target key start
LH: loop header
LB: loop body
LE: loop exit
PB: predicated region body
PF: predicated region fallthrough
CT: control target
= control target key end

     0   :  { %12 = vsyncpa [#allocation3], 0  ;;  %s805_s0 = inlined_call_operand.hbm [shape: f32[8,256], index: 0, kind: input, shape index: {}]   ;;  %s806_s1 = inlined_call_operand.hbm [shape: bf16[256,128], index: 1, kind: input, shape index: {}]   ;;  %s807_s2 = inlined_call_operand.vmem [shape: f32[1,128], index: 2, kind: input, shape index: {}]   ;;  %s808_s3 = inlined_call_operand.hbm [shape: bf16[128,128], index: 3, kind: input, shape index: {}]   ;;  %s809_s4 = inlined_call_operand.vmem [shape: f32[1,128], index: 4, kind: input, shape index: {}]   ;;  %s810_s5 = inlined_call_operand.hbm [shape: bf16[128,128], index: 5, kind: input, shape index: {}]   ;;  %s811_s6 = inlined_call_operand.vmem [shape: f32[1,128], index: 6, kind: input, shape index: {}]   ;;  %s812_s7 = inlined_call_operand.hbm [shape: f32[8,128], index: 7, kind: output, shape index: {}]  }
   0x1   :  { %13 = vsyncpa [#allocation6], 0 }
   0x2   :  { %14 = vsyncpa [#allocation9], 0  ;;  %s31_s26 = sshll.u32 %s806_s1, 4  ;;  %s32_s26 = int_to_ptr.hbm [resolvable:$true] %s31_s26 }
   0x3   :  { %15 = vsyncpa [#allocation4], 0  ;;  %s734_s27 = smov [#allocation5]   ;;  %s21_s8 = sshll.u32 %s805_s0, 4  ;;  %s22_s8 = int_to_ptr.hbm [resolvable:$true] %s21_s8 }
   0x4   :  { %s33_s28 = sshll.u32 %s734_s27, 4  ;;  %s735_s9 = smov 64   ;;  %s34_s28 = int_to_ptr.vmem [resolvable:$true] %s33_s28 }
   0x5   :  { %s736_s10 = smov 4   ;;  %s737_s11 = smov [#allocation2]  }
   0x6   :  { %39 = dma.hbm_to_vmem [thread:$0]  %s32_s26, 2048, %s34_s28, [#allocation6], %s735_s9, %s735_s9, %s736_s10  }
   0x7   :  { %s23_s12 = sshll.u32 %s737_s11, 4  ;;  %s46_s15 = sshll.u32 %s808_s3, 4  ;;  %s24_s12 = int_to_ptr.vmem [resolvable:$true] %s23_s12  ;;  %s47_s15 = int_to_ptr.hbm [resolvable:$true] %s46_s15 }
   0x8   :  { %26 = dma.hbm_to_vmem [thread:$0]  %s22_s8, 256, %s24_s12, [#allocation3]  }
   0x9   :  { %s61_s17 = sshll.u32 %s810_s5, 4  ;;  %s738_s18 = smov [#allocation7]   ;;  %s62_s17 = int_to_ptr.hbm [resolvable:$true] %s61_s17 }
   0xa   :  { %s48_s19 = sshll.u32 %s738_s18, 4  ;;  %s739_s0 = smov [#allocation8]   ;;  %s49_s19 = int_to_ptr.vmem [resolvable:$true] %s48_s19 }
   0xb   :  { %54 = dma.hbm_to_vmem [thread:$0]  %s47_s15, 1024, %s49_s19, [#allocation6], %s735_s9, %s735_s9, %s736_s10  }
   0xc   :  { %s63_s20 = sshll.u32 %s739_s0, 4  ;;  %s64_s20 = int_to_ptr.vmem [resolvable:$true] %s63_s20 }
   0xd   :  { %69 = dma.hbm_to_vmem [thread:$0]  %s62_s17, 1024, %s64_s20, [#allocation9], %s735_s9, %s735_s9, %s736_s10  }
   0xe   :  { %726 = dma.done.wait [#allocation3], 256  }
   0xf   :  { %727 = vsyncadd [#allocation3], 4294967040 }
  0x10   :  { %728 = dma.done.wait [#allocation6], 3072  }
  0x11   :  { %729 = vsyncadd [#allocation6], 4294964224 }
  0x12   :  { %730 = dma.done.wait [#allocation9], 1024  }
  0x13   :  { %731 = vsyncadd [#allocation9], 4294966272  ;;  %v571_v0 = vld [vmem:[#allocation5 + $0x38] sm:$0xff]  ;;  %v570_v2 = vld [vmem:[#allocation5 + $0x30] sm:$0xff]  ;;  %s740_s24 = smov [#allocation10]   ;;  %s424_s28 = sshll.u32 %s812_s7, 4  ;;  %s425_s28 = int_to_ptr.hbm [resolvable:$true] %s424_s28 }
  0x14   :  { %v579_v1 = vld [vmem:[#allocation5 + $0x78] sm:$0xff]  ;;  %224 = vmatpush.bf16.msra.mxu0 %v571_v0  ;;  %v578_v3 = vld [vmem:[#allocation5 + $0x70] sm:$0xff]  ;;  %v569_v4 = vld [vmem:[#allocation5 + $0x28] sm:$0xff]  ;;  %s422_s25 = sshll.u32 %s740_s24, 4  ;;  %s423_s25 = int_to_ptr.vmem [resolvable:$true] %s422_s25 }
  0x15   :  { %237 = vmatpush.bf16.msra.mxu1 %v579_v1  ;;  %v577_v5 = vld [vmem:[#allocation5 + $0x68] sm:$0xff]  ;;  %v587_v6 = vld [vmem:[#allocation7 + $0x38] sm:$0xff]  ;;  %v586_v7 = vld [vmem:[#allocation7 + $0x30] sm:$0xff] }
  0x16   :  { %320 = vmatpush.bf16.msra.mxu2 %v587_v6  ;;  %v568_v8 = vld [vmem:[#allocation5 + $0x20] sm:$0xff]  ;;  %v585_v10 = vld [vmem:[#allocation7 + $0x28] sm:$0xff]  ;;  %v567_v11 = vld [vmem:[#allocation5 + $0x18] sm:$0xff] }
  0x17   :  { %v576_v9 = vld [vmem:[#allocation5 + $0x60] sm:$0xff]  ;;  %v575_v12 = vld [vmem:[#allocation5 + $0x58] sm:$0xff]  ;;  %v566_v14 = vld [vmem:[#allocation5 + $0x10] sm:$0xff] }
  0x18   :  { %225 = vmatpush.bf16.msra.mxu0 %v570_v2  ;;  %v584_v13 = vld [vmem:[#allocation7 + $0x20] sm:$0xff]  ;;  %v574_v15 = vld [vmem:[#allocation5 + $0x50] sm:$0xff]  ;;  %v583_v16 = vld [vmem:[#allocation7 + $0x18] sm:$0xff] }
  0x19   :  { %238 = vmatpush.bf16.msra.mxu1 %v578_v3  ;;  %v565_v17 = vld [vmem:[#allocation5 + $0x8] sm:$0xff]  ;;  %v582_v19 = vld [vmem:[#allocation7 + $0x10] sm:$0xff]  ;;  %v564_v20 = vld [vmem:[#allocation5] sm:$0xff] }
  0x1a   :  { %321 = vmatpush.bf16.msra.mxu2 %v586_v7  ;;  %v573_v18 = vld [vmem:[#allocation5 + $0x48] sm:$0xff]  ;;  %v572_v21 = vld [vmem:[#allocation5 + $0x40] sm:$0xff]  ;;  %v88_v22 = vld [vmem:[#allocation2] sm:$0xff] }
  0x1b   :  { %v89_v23 = vld [vmem:[#allocation2 + $0x8] sm:$0xff]  ;;  %v90_v24 = vpack.c.bf16 %v88_v22, %v88_v22  ;;  %v581_v26 = vld [vmem:[#allocation7 + $0x8] sm:$0xff]  ;;  %v580_v27 = vld [vmem:[#allocation7] sm:$0xff] }
  0x1c   :  { %226 = vmatpush.bf16.msra.mxu0 %v569_v4  ;;  %v91_v25 = vpack.c.bf16 %v89_v23, %v89_v23  ;;  %v595_v28 = vld [vmem:[#allocation8 + $0x38] sm:$0xff]  ;;  %v594_v29 = vld [vmem:[#allocation8 + $0x30] sm:$0xff]  ;;  %v593_v30 = vld [vmem:[#allocation8 + $0x28] sm:$0xff] }
  0x1d   :  { %239 = vmatpush.bf16.msra.mxu1 %v577_v5  ;;  %403 = vmatpush.bf16.msra.mxu3 %v595_v28  ;;  %v592_v31 = vld [vmem:[#allocation8 + $0x20] sm:$0xff]  ;;  %v591_v32 = vld [vmem:[#allocation8 + $0x18] sm:$0xff]  ;;  %v590_v33 = vld [vmem:[#allocation8 + $0x10] sm:$0xff] }
  0x1e   :  { %322 = vmatpush.bf16.msra.mxu2 %v585_v10  ;;  %v603_v34 = vld [vmem:[%s807_s2] ss:$0 sm:$0xff]  ;;  %v589_v43 = vld [vmem:[#allocation8 + $0x8] sm:$0xff]  ;;  %v588_v44 = vld [vmem:[#allocation8] sm:$0xff] }
  0x1f   :  { %v604_v45 = vld [vmem:[%s809_s4] ss:$0 sm:$0xff] }
  0x20   :  { %227 = vmatpush.bf16.msra.mxu0 %v568_v8  ;;  %v605_v51 = vld [vmem:[%s811_s6] ss:$0 sm:$0xff] }
  0x21   :  { %240 = vmatpush.bf16.msra.mxu1 %v576_v9  ;;  %404 = vmatpush.bf16.msra.mxu3 %v594_v29 }
  0x22   :  { %323 = vmatpush.bf16.msra.mxu2 %v584_v13 }
  0x24   :  { %228 = vmatpush.bf16.msra.mxu0 %v567_v11 }
  0x25   :  { %241 = vmatpush.bf16.msra.mxu1 %v575_v12  ;;  %405 = vmatpush.bf16.msra.mxu3 %v593_v30 }
  0x26   :  { %324 = vmatpush.bf16.msra.mxu2 %v583_v16 }
  0x28   :  { %229 = vmatpush.bf16.msra.mxu0 %v566_v14 }
  0x29   :  { %242 = vmatpush.bf16.msra.mxu1 %v574_v15  ;;  %406 = vmatpush.bf16.msra.mxu3 %v592_v31 }
  0x2a   :  { %325 = vmatpush.bf16.msra.mxu2 %v582_v19 }
  0x2c   :  { %230 = vmatpush.bf16.msra.mxu0 %v565_v17 }
  0x2d   :  { %243 = vmatpush.bf16.msra.mxu1 %v573_v18  ;;  %407 = vmatpush.bf16.msra.mxu3 %v591_v32 }
  0x2e   :  { %326 = vmatpush.bf16.msra.mxu2 %v581_v26 }
  0x30   :  { %231 = vmatpush.bf16.msra.mxu0 %v564_v20 }
  0x31   :  { %244 = vmatpush.bf16.msra.mxu1 %v572_v21  ;;  %408 = vmatpush.bf16.msra.mxu3 %v590_v33 }
  0x32   :  { %327 = vmatpush.bf16.msra.mxu2 %v580_v27 }
  0x33   :  { %232 = vmatmul.bf16.vlgmr.msra.gmra.mxu0 %v90_v24 }
  0x34   :  { %245 = vmatmul.bf16.vlgmr.msra.gmra.mxu1 %v91_v25 }
  0x35   :  { %409 = vmatpush.bf16.msra.mxu3 %v589_v43 }
  0x39   :  { %410 = vmatpush.bf16.msra.mxu3 %v588_v44 }
  0xb0   :  { %v233_v35 = vpop.f32.mrf.mxu0 }
  0xb1   :  { %v246_v36 = vpop.f32.mrf.mxu1  ;;  %v234_v37 = vadd.f32 %v603_v34, %v233_v35 }
  0xb3   :  { %v247_v38 = vadd.f32 %v246_v36, %v234_v37 }
  0xb5   :  { %v250_v39 = vmax.f32 %v247_v38, 0.0 }
  0xb7   :  { %v251_v40 = vpack.c.bf16 %v250_v39, %v250_v39 }
  0xb8   :  { %v235_v41 = vpop.f32.mrf.mxu0 }
  0xb9   :  { %v248_v42 = vpop.f32.mrf.mxu1  ;;  %328 = vmatmul.bf16.vlgmr.msra.gmra.mxu2 %v251_v40 }
 0x13c   :  { %v329_v46 = vpop.f32.mrf.mxu2 }
 0x13d   :  { %v330_v47 = vadd.f32 %v604_v45, %v329_v46 }
 0x13f   :  { %v333_v48 = vmax.f32 %v330_v47, 0.0 }
 0x141   :  { %v334_v49 = vpack.c.bf16 %v333_v48, %v333_v48 }
 0x143   :  { %411 = vmatmul.bf16.vlgmr.msra.gmra.mxu3 %v334_v49 }
 0x144   :  { %v331_v50 = vpop.f32.mrf.mxu2 }
 0x1c6   :  { %v412_v52 = vpop.f32.mrf.mxu3 }
 0x1c7   :  { %v413_v53 = vadd.f32 %v605_v51, %v412_v52 }
 0x1c9   :  { %416 = vst [vmem:[#allocation10] sm:$0xff] %v413_v53 }
 0x1ca   :  { %427 = dma.vmem_to_hbm [thread:$0]  %s423_s25, 128, %s425_s28, [#allocation4]  }
 0x1ce   :  { %v414_v54 = vpop.f32.mrf.mxu3 }
 0x1cf   :  { %732 = dma.done.wait [#allocation4], 128  }
 0x1d0   :  { %733 = vsyncadd [#allocation4], 4294967168 }
 0x1d1   :  { %432 = vsyncpa [#allocation3], 1 }
 0x1d2   :  { %433 = vsyncpa [#allocation6], 1 }
 0x1d3   :  { %434 = vsyncpa [#allocation9], 1 }
 0x1d4   :  { %435 = vsyncpa [#allocation4], 1 }

</bundles_post_ra>
